<compile_context>
chip_gen: v7x
topology: tpu7x:2x2x1
jax: 0.10.0
libtpu: 0.0.40
codegen_flags: <defaults>
</compile_context>

<pallas_src>
import functools
import inspect

import jax
import jax.numpy as jnp
from jax.experimental import pallas as pl
from jax.experimental.pallas import tpu as pltpu

_LANE = 128
_SUBLANE = 8


def _round_up(v: int, m: int) -> int:
    return ((v + m - 1) // m) * m


try:
    _HAS_PIPELINE_MODE = hasattr(pl, "Buffered") and (
        "pipeline_mode" in inspect.signature(pl.BlockSpec).parameters
    )
except Exception:  # pragma: no cover
    _HAS_PIPELINE_MODE = False


def _tpu_info():
    """Returns (vmem_capacity_bytes_per_core, tensorcores_per_chip)."""
    kind = ""
    try:
        kind = jax.devices()[0].device_kind.lower()
    except Exception:  # pragma: no cover
        pass
    num_tc = 2 if "v7" in kind else 1
    cap = None
    try:
        cap = int(pltpu.get_tpu_info().vmem_capacity_bytes)
    except Exception:
        cap = None
    if cap is None or cap <= 0:
        cap = (64 if "v7" in kind else 128) * 1024 * 1024
    return cap, num_tc


# ---------------------------------------------------------------------------
# Kernel
# ---------------------------------------------------------------------------
def _mlp_base_kernel(*refs, n_layers):
    """One batch tile of the fused MLP base() forward.

    refs layout:
      refs[0]             : x tile   (TM, Pin)          f32   (streamed)
      refs[1 : 1+L]       : weights  (Pin_l, Pout_l)    param_dtype (VMEM-resident)
      refs[1+L : 1+2L]    : biases   (1, Pout_l)        f32   (VMEM-resident)
      refs[1+2L]          : out tile (TM, Pout_last)    f32   (streamed)
    """
    x_ref = refs[0]
    w_refs = refs[1:1 + n_layers]
    b_refs = refs[1 + n_layers:1 + 2 * n_layers]
    out_ref = refs[1 + 2 * n_layers]

    h = x_ref[...]                                       # (TM, Pin) f32
    for l in range(n_layers):
        w = w_refs[l][...]
        lhs = h if h.dtype == w.dtype else h.astype(w.dtype)   # bf16 MXU inputs
        # MXU matmul with f32 accumulation; bias broadcast (1, P) -> (TM, P).
        h = jnp.dot(lhs, w, preferred_element_type=jnp.float32) + b_refs[l][...]
        if l >= 1:  # ReLU after every Linear except the very first (PyTorch order)
            h = jnp.maximum(h, 0.0)
    out_ref[...] = h.astype(out_ref.dtype)


# ---------------------------------------------------------------------------
# Wrapper
# ---------------------------------------------------------------------------
def mlp_base_forward(
    x,
    weights,
    biases,
    *,
    param_dtype=jnp.bfloat16,    # bf16 MXU inputs with f32 accumulation (default)
    max_tile_rows=512,
    use_pallas=None,             # None = auto: plain-XLA fallback for tiny problems
    small_problem_flops=4e6,
):
    """Run MLPBase.base() as a single batch-gridded pallas_call.

    Args:
      x:       [batch, in_size] float32
      weights: list of [in_f, out_f] float32 arrays (x @ W + b layout)
      biases:  list of [out_f] float32 arrays
    Returns:
      hidden:  [batch, layer_widths[-1]] float32
    """
    n_layers = len(weights)
    batch, in_size = x.shape
    out_dim = weights[-1].shape[1]
    param_dtype = jnp.dtype(param_dtype)
    itemsize = param_dtype.itemsize

    # --- per-layer lane-dense (128) padded shapes; no uniform PxP stack.
    p_in = _round_up(in_size, _LANE)
    p_ins = [_round_up(w.shape[0], _LANE) for w in weights]
    p_outs = [_round_up(w.shape[1], _LANE) for w in weights]
    p_out = p_outs[-1]

    padded_flops = 2 * batch * sum(pi * po for pi, po in zip(p_ins, p_outs))
    if use_pallas is None:
        # Pallas fixed per-step / custom-call overhead dominates tiny MLPs.
        use_pallas = padded_flops >= small_problem_flops
    if not use_pallas:
        return mlp_base_reference(x, weights, biases)

    # --- pad & cast parameters.  Zero padding keeps padded lanes exactly zero
    # through every layer (zero weight rows/cols + zero bias; ReLU(0)=0).
    w_pads, b_pads = [], []
    for w, b in zip(weights, biases):
        fi, fo = w.shape
        pi, po = _round_up(fi, _LANE), _round_up(fo, _LANE)
        w_pads.append(
            jnp.zeros((pi, po), param_dtype).at[:fi, :fo].set(w.astype(param_dtype)))
        b_pads.append(
            jnp.zeros((1, po), jnp.float32).at[0, :fo].set(b.astype(jnp.float32)))

    # --- per-TensorCore VMEM budget (weights duplicated in each TC's VMEM when
    # the batch axis is 'parallel'): ~54 MiB on v7x, ~109 MiB on v5e/v6e.
    vmem_cap, num_tc = _tpu_info()
    vmem_budget = int(0.85 * vmem_cap)

    raw_param_bytes = (sum(w.size for w in w_pads) * itemsize
                       + sum(b.size for b in b_pads) * 4)
    param_bytes = raw_param_bytes * (1 if _HAS_PIPELINE_MODE else 2)

    def _act_bytes(tm):
        # double-buffered streaming x/out tiles + live f32 intermediates
        return (2 * tm * p_in * 4 + 2 * tm * p_out * 4
                + 2 * tm * max([p_in] + p_outs) * 4)

    # --- batch tiling: balanced row tiles (minimal padding) and >= num_tc grid
    # steps so dimension_semantics=('parallel',) uses both v7x TensorCores.
    min_tiles = num_tc if batch >= _SUBLANE * num_tc else 1
    n_tiles = max(pl.cdiv(batch, max_tile_rows), min_tiles)
    tm = _round_up(pl.cdiv(batch, n_tiles), _SUBLANE)
    while tm > _SUBLANE and param_bytes + _act_bytes(tm) > vmem_budget:
        tm = _round_up(pl.cdiv(tm, 2), _SUBLANE)
    if param_bytes + _act_bytes(tm) > vmem_budget:
        # TODO(synk): for nets whose resident parameters alone exceed one core's
        # VMEM, add a K/N reduction grid over the large layers instead of keeping
        # them resident; fall back to plain XLA for now (correct, just not fused).
        return mlp_base_reference(x, weights, biases)

    batch_pad = _round_up(batch, tm)
    grid = (batch_pad // tm,)

    x_pad = jnp.zeros((batch_pad, p_in), jnp.float32)
    x_pad = x_pad.at[:batch, :in_size].set(x.astype(jnp.float32))

    # --- advisory cost over the shapes actually moved / computed (padded, bf16 weights).
    cost = pl.CostEstimate(
        flops=2 * batch_pad * sum(w.size for w in w_pads),
        transcendentals=0,
        bytes_accessed=(batch_pad * p_in * 4 + batch_pad * p_out * 4
                        + sum(w.size for w in w_pads) * itemsize
                        + sum(b.size for b in b_pads) * 4),
    )

    kernel = functools.partial(_mlp_base_kernel, n_layers=n_layers)

    def _call(single_buffer_params):
        def param_spec(shape):
            idx = lambda i: (0,) * len(shape)
            if single_buffer_params:
                # constant index_map -> nothing to re-fetch; halve the footprint.
                return pl.BlockSpec(shape, idx, pipeline_mode=pl.Buffered(1))
            return pl.BlockSpec(shape, idx)

        pbytes = raw_param_bytes * (1 if single_buffer_params else 2)
        needed = pbytes + _act_bytes(tm)
        vmem_limit = int(min(max(int(needed * 1.25), 32 * 1024 * 1024), vmem_budget))

        in_specs = (
            [pl.BlockSpec((tm, p_in), lambda i: (i, 0))]               # x tile
            + [param_spec(w.shape) for w in w_pads]                    # weights (resident)
            + [param_spec(b.shape) for b in b_pads]                    # biases  (resident)
        )
        return pl.pallas_call(
            kernel,
            out_shape=jax.ShapeDtypeStruct((batch_pad, p_out), jnp.float32),
            grid=grid,
            in_specs=in_specs,
            out_specs=pl.BlockSpec((tm, p_out), lambda i: (i, 0)),     # lane-dense out
            compiler_params=pltpu.CompilerParams(
                dimension_semantics=("parallel",),
                vmem_limit_bytes=vmem_limit,
            ),
            cost_estimate=cost,
        )(x_pad, *w_pads, *b_pads)

    if _HAS_PIPELINE_MODE:
        try:
            out_pad = _call(True)
        except Exception:  # pragma: no cover - Buffered(1) unsupported in this jax
            out_pad = _call(False)
    else:
        out_pad = _call(False)

    return out_pad[:batch, :out_dim]


# ---------------------------------------------------------------------------
# Reference / init helpers
# ---------------------------------------------------------------------------
def init_mlp_base_params(key, in_size, layer_widths):
    """nn.Linear-style U(-1/sqrt(fan_in), +1/sqrt(fan_in)) init (transposed layout)."""
    dims = [in_size] + list(layer_widths)
    weights, biases = [], []
    for fan_in, fan_out in zip(dims[:-1], dims[1:]):
        key, kw, kb = jax.random.split(key, 3)
        bound = 1.0 / jnp.sqrt(jnp.float32(fan_in))
        weights.append(
            jax.random.uniform(kw, (fan_in, fan_out), jnp.float32, -bound, bound))
        biases.append(jax.random.uniform(kb, (fan_out,), jnp.float32, -bound, bound))
    return weights, biases


def mlp_base_reference(x, weights, biases, compute_dtype=None):
    """Pure-JAX reference of the PyTorch Sequential.

    compute_dtype=None    -> plain f32 matmuls (matches the module's math).
    compute_dtype=bf16    -> mirrors the kernel's bf16-input / f32-accumulate path.
    """
    h = x.astype(jnp.float32)
    for l, (w, b) in enumerate(zip(weights, biases)):
        if compute_dtype is None:
            h = h @ w + b
        else:
            h = jnp.dot(h.astype(compute_dtype), w.astype(compute_dtype),
                        preferred_element_type=jnp.float32) + b.astype(jnp.float32)
        if l >= 1:
            h = jnp.maximum(h, 0.0)
    return h


# TODO(synk): MLPBase.head / MLPBase.predict are abstract (implemented by child
# classes), so only the base() forward pass is implemented here.


if __name__ == "__main__":
    # Shapes consistent with the module: params = {'in_size': 16,
    # 'layer_widths': [32, 64, 32]}, batch = 8.
    params = {"in_size": 16, "layer_widths": [32, 64, 32]}
    batch = 8

    key = jax.random.PRNGKey(0)
    key, kx = jax.random.split(key)
    x = jax.random.normal(kx, (batch, params["in_size"]), jnp.float32)
    weights, biases = init_mlp_base_params(
        key, params["in_size"], params["layer_widths"])

    ref_f32 = mlp_base_reference(x, weights, biases)

    # f32-parameter path: exact structural check against the XLA reference.
    # (use_pallas=True forces the Pallas kernel even at these tiny test shapes.)
    out_f32 = mlp_base_forward(
        x, weights, biases, param_dtype=jnp.float32, use_pallas=True)
    out_f32 = jax.block_until_ready(out_f32)
    assert out_f32.shape == (batch, params["layer_widths"][-1])
    assert jnp.allclose(out_f32, ref_f32, atol=1e-4, rtol=1e-4), (
        float(jnp.max(jnp.abs(out_f32 - ref_f32))))

    # Default bf16 MXU path (f32 accumulation): compare against a reference using
    # the same bf16 casts, plus a loose sanity check against the pure-f32 math.
    out_bf16 = mlp_base_forward(x, weights, biases, use_pallas=True)
    out_bf16 = jax.block_until_ready(out_bf16)
    ref_bf16 = mlp_base_reference(x, weights, biases, compute_dtype=jnp.bfloat16)
    assert out_bf16.shape == (batch, params["layer_widths"][-1])
    assert jnp.allclose(out_bf16, ref_bf16, atol=1e-3, rtol=1e-3), (
        float(jnp.max(jnp.abs(out_bf16 - ref_bf16))))
    assert jnp.allclose(out_bf16, ref_f32, atol=5e-2, rtol=5e-2), (
        float(jnp.max(jnp.abs(out_bf16 - ref_f32))))

    print("KERNEL_OK")
</pallas_src>

<mosaic_0001>
module attributes {stable_mosaic.version = 11 : i64} {
  func.func @_mlp_base_kernel(%arg0: i32, %arg1: memref<8x128xf32, #tpu.memory_space<vmem>>, %arg2: memref<128x128xf32, #tpu.memory_space<vmem>>, %arg3: memref<128x128xf32, #tpu.memory_space<vmem>>, %arg4: memref<128x128xf32, #tpu.memory_space<vmem>>, %arg5: memref<1x128xf32, #tpu.memory_space<vmem>>, %arg6: memref<1x128xf32, #tpu.memory_space<vmem>>, %arg7: memref<1x128xf32, #tpu.memory_space<vmem>>, %arg8: memref<8x128xf32, #tpu.memory_space<vmem>>) attributes {dimension_semantics = [#tpu.dimension_semantics<parallel>], iteration_bounds = array<i64: 1>, scalar_prefetch = 0 : i64, scratch_operands = 0 : i64, tpu.core_type = #tpu.core_type<tc>, window_params = [{transform_indices = @transform_0, window_bounds = array<i64: 8, 128>}, {pipeline_mode = #tpu.pipeline_mode<synchronous>, transform_indices = @transform_1, window_bounds = array<i64: 128, 128>}, {pipeline_mode = #tpu.pipeline_mode<synchronous>, transform_indices = @transform_2, window_bounds = array<i64: 128, 128>}, {pipeline_mode = #tpu.pipeline_mode<synchronous>, transform_indices = @transform_3, window_bounds = array<i64: 128, 128>}, {pipeline_mode = #tpu.pipeline_mode<synchronous>, transform_indices = @transform_4, window_bounds = array<i64: 1, 128>}, {pipeline_mode = #tpu.pipeline_mode<synchronous>, transform_indices = @transform_5, window_bounds = array<i64: 1, 128>}, {pipeline_mode = #tpu.pipeline_mode<synchronous>, transform_indices = @transform_6, window_bounds = array<i64: 1, 128>}, {transform_indices = @transform_7, window_bounds = array<i64: 8, 128>}]} {
    %c0 = arith.constant 0 : index
    %c0_0 = arith.constant 0 : index
    %0 = vector.load %arg1[%c0, %c0_0] : memref<8x128xf32, #tpu.memory_space<vmem>>, vector<8x128xf32>
    %c0_1 = arith.constant 0 : index
    %c0_2 = arith.constant 0 : index
    %1 = vector.load %arg2[%c0_1, %c0_2] : memref<128x128xf32, #tpu.memory_space<vmem>>, vector<128x128xf32>
    %cst = arith.constant dense<0.000000e+00> : vector<8x128xf32>
    %2 = tpu.matmul %0, %1, %cst {dimension_numbers = #tpu.dot_dimension_numbers<[1], [0], [0], [1], [0, 0, 1, 1], [], []>} : vector<8x128xf32>, vector<128x128xf32>, vector<8x128xf32> -> vector<8x128xf32>
    %c0_3 = arith.constant 0 : index
    %c0_4 = arith.constant 0 : index
    %3 = vector.load %arg5[%c0_3, %c0_4] : memref<1x128xf32, #tpu.memory_space<vmem>>, vector<1x128xf32>
    %4 = vector.broadcast %3 : vector<1x128xf32> to vector<8x128xf32>
    %5 = arith.addf %2, %4 : vector<8x128xf32>
    %c0_5 = arith.constant 0 : index
    %c0_6 = arith.constant 0 : index
    %6 = vector.load %arg3[%c0_5, %c0_6] : memref<128x128xf32, #tpu.memory_space<vmem>>, vector<128x128xf32>
    %cst_7 = arith.constant dense<0.000000e+00> : vector<8x128xf32>
    %7 = tpu.matmul %5, %6, %cst_7 {dimension_numbers = #tpu.dot_dimension_numbers<[1], [0], [0], [1], [0, 0, 1, 1], [], []>} : vector<8x128xf32>, vector<128x128xf32>, vector<8x128xf32> -> vector<8x128xf32>
    %c0_8 = arith.constant 0 : index
    %c0_9 = arith.constant 0 : index
    %8 = vector.load %arg6[%c0_8, %c0_9] : memref<1x128xf32, #tpu.memory_space<vmem>>, vector<1x128xf32>
    %9 = vector.broadcast %8 : vector<1x128xf32> to vector<8x128xf32>
    %10 = arith.addf %7, %9 : vector<8x128xf32>
    %cst_10 = arith.constant 0.000000e+00 : f32
    %11 = vector.broadcast %cst_10 : f32 to vector<8x128xf32>
    %12 = arith.maximumf %10, %11 : vector<8x128xf32>
    %c0_11 = arith.constant 0 : index
    %c0_12 = arith.constant 0 : index
    %13 = vector.load %arg4[%c0_11, %c0_12] : memref<128x128xf32, #tpu.memory_space<vmem>>, vector<128x128xf32>
    %cst_13 = arith.constant dense<0.000000e+00> : vector<8x128xf32>
    %14 = tpu.matmul %12, %13, %cst_13 {dimension_numbers = #tpu.dot_dimension_numbers<[1], [0], [0], [1], [0, 0, 1, 1], [], []>} : vector<8x128xf32>, vector<128x128xf32>, vector<8x128xf32> -> vector<8x128xf32>
    %c0_14 = arith.constant 0 : index
    %c0_15 = arith.constant 0 : index
    %15 = vector.load %arg7[%c0_14, %c0_15] : memref<1x128xf32, #tpu.memory_space<vmem>>, vector<1x128xf32>
    %16 = vector.broadcast %15 : vector<1x128xf32> to vector<8x128xf32>
    %17 = arith.addf %14, %16 : vector<8x128xf32>
    %cst_16 = arith.constant 0.000000e+00 : f32
    %18 = vector.broadcast %cst_16 : f32 to vector<8x128xf32>
    %19 = arith.maximumf %17, %18 : vector<8x128xf32>
    %c0_17 = arith.constant 0 : index
    %c0_18 = arith.constant 0 : index
    %20 = vector.load %arg8[%c0_17, %c0_18] : memref<8x128xf32, #tpu.memory_space<vmem>>, vector<8x128xf32>
    tpu.vector_store %arg8[%c0_17, %c0_18], %19 {strides = array<i32>} : memref<8x128xf32, #tpu.memory_space<vmem>>, vector<8x128xf32>,
    return
  }
  func.func @transform_0(%arg0: i32) -> (i32, i32) {
    %c0_i32 = arith.constant 0 : i32
    %c0_i32_0 = arith.constant 0 : i32
    return %arg0, %c0_i32 : i32, i32
  }
  func.func @transform_1(%arg0: i32) -> (i32, i32) {
    %c0_i32 = arith.constant 0 : i32
    %c0_i32_0 = arith.constant 0 : i32
    %c0_i32_1 = arith.constant 0 : i32
    return %c0_i32, %c0_i32_0 : i32, i32
  }
  func.func @transform_2(%arg0: i32) -> (i32, i32) {
    %c0_i32 = arith.constant 0 : i32
    %c0_i32_0 = arith.constant 0 : i32
    %c0_i32_1 = arith.constant 0 : i32
    return %c0_i32, %c0_i32_0 : i32, i32
  }
  func.func @transform_3(%arg0: i32) -> (i32, i32) {
    %c0_i32 = arith.constant 0 : i32
    %c0_i32_0 = arith.constant 0 : i32
    %c0_i32_1 = arith.constant 0 : i32
    return %c0_i32, %c0_i32_0 : i32, i32
  }
  func.func @transform_4(%arg0: i32) -> (i32, i32) {
    %c0_i32 = arith.constant 0 : i32
    %c0_i32_0 = arith.constant 0 : i32
    %c0_i32_1 = arith.constant 0 : i32
    return %c0_i32, %c0_i32_0 : i32, i32
  }
  func.func @transform_5(%arg0: i32) -> (i32, i32) {
    %c0_i32 = arith.constant 0 : i32
    %c0_i32_0 = arith.constant 0 : i32
    %c0_i32_1 = arith.constant 0 : i32
    return %c0_i32, %c0_i32_0 : i32, i32
  }
  func.func @transform_6(%arg0: i32) -> (i32, i32) {
    %c0_i32 = arith.constant 0 : i32
    %c0_i32_0 = arith.constant 0 : i32
    %c0_i32_1 = arith.constant 0 : i32
    return %c0_i32, %c0_i32_0 : i32, i32
  }
  func.func @transform_7(%arg0: i32) -> (i32, i32) {
    %c0_i32 = arith.constant 0 : i32
    %c0_i32_0 = arith.constant 0 : i32
    return %arg0, %c0_i32 : i32, i32
  }
}

module attributes {stable_mosaic.version = 11 : i64} {
  func.func @_mlp_base_kernel(%arg0: i32, %arg1: memref<8x128xf32, #tpu.memory_space<vmem>>, %arg2: memref<128x128xf32, #tpu.memory_space<vmem>>, %arg3: memref<128x128xf32, #tpu.memory_space<vmem>>, %arg4: memref<128x128xf32, #tpu.memory_space<vmem>>, %arg5: memref<1x128xf32, #tpu.memory_space<vmem>>, %arg6: memref<1x128xf32, #tpu.memory_space<vmem>>, %arg7: memref<1x128xf32, #tpu.memory_space<vmem>>, %arg8: memref<8x128xf32, #tpu.memory_space<vmem>>) attributes {dimension_semantics = [#tpu.dimension_semantics<parallel>], iteration_bounds = array<i64: 1>, scalar_prefetch = 0 : i64, scratch_operands = 0 : i64, tpu.core_type = #tpu.core_type<tc>, window_params = [{transform_indices = @transform_0, window_bounds = array<i64: 8, 128>}, {pipeline_mode = #tpu.pipeline_mode<synchronous>, transform_indices = @transform_1, window_bounds = array<i64: 128, 128>}, {pipeline_mode = #tpu.pipeline_mode<synchronous>, transform_indices = @transform_2, window_bounds = array<i64: 128, 128>}, {pipeline_mode = #tpu.pipeline_mode<synchronous>, transform_indices = @transform_3, window_bounds = array<i64: 128, 128>}, {pipeline_mode = #tpu.pipeline_mode<synchronous>, transform_indices = @transform_4, window_bounds = array<i64: 1, 128>}, {pipeline_mode = #tpu.pipeline_mode<synchronous>, transform_indices = @transform_5, window_bounds = array<i64: 1, 128>}, {pipeline_mode = #tpu.pipeline_mode<synchronous>, transform_indices = @transform_6, window_bounds = array<i64: 1, 128>}, {transform_indices = @transform_7, window_bounds = array<i64: 8, 128>}]} {
    %c0 = arith.constant 0 : index
    %c0_0 = arith.constant 0 : index
    %0 = vector.load %arg1[%c0, %c0_0] : memref<8x128xf32, #tpu.memory_space<vmem>>, vector<8x128xf32>
    %c0_1 = arith.constant 0 : index
    %c0_2 = arith.constant 0 : index
    %1 = vector.load %arg2[%c0_1, %c0_2] : memref<128x128xf32, #tpu.memory_space<vmem>>, vector<128x128xf32>
    %cst = arith.constant dense<0.000000e+00> : vector<8x128xf32>
    %2 = tpu.matmul %0, %1, %cst {dimension_numbers = #tpu.dot_dimension_numbers<[1], [0], [0], [1], [0, 0, 1, 1], [], []>} : vector<8x128xf32>, vector<128x128xf32>, vector<8x128xf32> -> vector<8x128xf32>
    %c0_3 = arith.constant 0 : index
    %c0_4 = arith.constant 0 : index
    %3 = vector.load %arg5[%c0_3, %c0_4] : memref<1x128xf32, #tpu.memory_space<vmem>>, vector<1x128xf32>
    %4 = vector.broadcast %3 : vector<1x128xf32> to vector<8x128xf32>
    %5 = arith.addf %2, %4 : vector<8x128xf32>
    %c0_5 = arith.constant 0 : index
    %c0_6 = arith.constant 0 : index
    %6 = vector.load %arg3[%c0_5, %c0_6] : memref<128x128xf32, #tpu.memory_space<vmem>>, vector<128x128xf32>
    %cst_7 = arith.constant dense<0.000000e+00> : vector<8x128xf32>
    %7 = tpu.matmul %5, %6, %cst_7 {dimension_numbers = #tpu.dot_dimension_numbers<[1], [0], [0], [1], [0, 0, 1, 1], [], []>} : vector<8x128xf32>, vector<128x128xf32>, vector<8x128xf32> -> vector<8x128xf32>
    %c0_8 = arith.constant 0 : index
    %c0_9 = arith.constant 0 : index
    %8 = vector.load %arg6[%c0_8, %c0_9] : memref<1x128xf32, #tpu.memory_space<vmem>>, vector<1x128xf32>
    %9 = vector.broadcast %8 : vector<1x128xf32> to vector<8x128xf32>
    %10 = arith.addf %7, %9 : vector<8x128xf32>
    %cst_10 = arith.constant 0.000000e+00 : f32
    %11 = vector.broadcast %cst_10 : f32 to vector<8x128xf32>
    %12 = arith.maximumf %10, %11 : vector<8x128xf32>
    %c0_11 = arith.constant 0 : index
    %c0_12 = arith.constant 0 : index
    %13 = vector.load %arg4[%c0_11, %c0_12] : memref<128x128xf32, #tpu.memory_space<vmem>>, vector<128x128xf32>
    %cst_13 = arith.constant dense<0.000000e+00> : vector<8x128xf32>
    %14 = tpu.matmul %12, %13, %cst_13 {dimension_numbers = #tpu.dot_dimension_numbers<[1], [0], [0], [1], [0, 0, 1, 1], [], []>} : vector<8x128xf32>, vector<128x128xf32>, vector<8x128xf32> -> vector<8x128xf32>
    %c0_14 = arith.constant 0 : index
    %c0_15 = arith.constant 0 : index
    %15 = vector.load %arg7[%c0_14, %c0_15] : memref<1x128xf32, #tpu.memory_space<vmem>>, vector<1x128xf32>
    %16 = vector.broadcast %15 : vector<1x128xf32> to vector<8x128xf32>
    %17 = arith.addf %14, %16 : vector<8x128xf32>
    %cst_16 = arith.constant 0.000000e+00 : f32
    %18 = vector.broadcast %cst_16 : f32 to vector<8x128xf32>
    %19 = arith.maximumf %17, %18 : vector<8x128xf32>
    %c0_17 = arith.constant 0 : index
    %c0_18 = arith.constant 0 : index
    %20 = vector.load %arg8[%c0_17, %c0_18] : memref<8x128xf32, #tpu.memory_space<vmem>>, vector<8x128xf32>
    tpu.vector_store %arg8[%c0_17, %c0_18], %19 {strides = array<i32>} : memref<8x128xf32, #tpu.memory_space<vmem>>, vector<8x128xf32>,
    return
  }
  func.func @transform_0(%arg0: i32) -> (i32, i32) {
    %c0_i32 = arith.constant 0 : i32
    %c0_i32_0 = arith.constant 0 : i32
    return %arg0, %c0_i32 : i32, i32
  }
  func.func @transform_1(%arg0: i32) -> (i32, i32) {
    %c0_i32 = arith.constant 0 : i32
    %c0_i32_0 = arith.constant 0 : i32
    %c0_i32_1 = arith.constant 0 : i32
    return %c0_i32, %c0_i32_0 : i32, i32
  }
  func.func @transform_2(%arg0: i32) -> (i32, i32) {
    %c0_i32 = arith.constant 0 : i32
    %c0_i32_0 = arith.constant 0 : i32
    %c0_i32_1 = arith.constant 0 : i32
    return %c0_i32, %c0_i32_0 : i32, i32
  }
  func.func @transform_3(%arg0: i32) -> (i32, i32) {
    %c0_i32 = arith.constant 0 : i32
    %c0_i32_0 = arith.constant 0 : i32
    %c0_i32_1 = arith.constant 0 : i32
    return %c0_i32, %c0_i32_0 : i32, i32
  }
  func.func @transform_4(%arg0: i32) -> (i32, i32) {
    %c0_i32 = arith.constant 0 : i32
    %c0_i32_0 = arith.constant 0 : i32
    %c0_i32_1 = arith.constant 0 : i32
    return %c0_i32, %c0_i32_0 : i32, i32
  }
  func.func @transform_5(%arg0: i32) -> (i32, i32) {
    %c0_i32 = arith.constant 0 : i32
    %c0_i32_0 = arith.constant 0 : i32
    %c0_i32_1 = arith.constant 0 : i32
    return %c0_i32, %c0_i32_0 : i32, i32
  }
  func.func @transform_6(%arg0: i32) -> (i32, i32) {
    %c0_i32 = arith.constant 0 : i32
    %c0_i32_0 = arith.constant 0 : i32
    %c0_i32_1 = arith.constant 0 : i32
    return %c0_i32, %c0_i32_0 : i32, i32
  }
  func.func @transform_7(%arg0: i32) -> (i32, i32) {
    %c0_i32 = arith.constant 0 : i32
    %c0_i32_0 = arith.constant 0 : i32
    return %arg0, %c0_i32 : i32, i32
  }
}

</mosaic_0001>

<bundles_post_ra>
// kernel: tpu_custom_call.1
= control target key start
LH: loop header
LB: loop body
LE: loop exit
PB: predicated region body
PF: predicated region fallthrough
CT: control target
= control target key end

     0   :  { %12 = vsyncpa [#allocation3], 0  ;;  %s897_s0 = inlined_call_operand.hbm [shape: f32[8,128], index: 0, kind: input, shape index: {}]   ;;  %s898_s1 = inlined_call_operand.hbm [shape: f32[128,128], index: 1, kind: input, shape index: {}]   ;;  %s899_s2 = inlined_call_operand.hbm [shape: f32[128,128], index: 2, kind: input, shape index: {}]   ;;  %s900_s3 = inlined_call_operand.hbm [shape: f32[128,128], index: 3, kind: input, shape index: {}]   ;;  %s901_s4 = inlined_call_operand.vmem [shape: f32[1,128], index: 4, kind: input, shape index: {}]   ;;  %s902_s5 = inlined_call_operand.vmem [shape: f32[1,128], index: 5, kind: input, shape index: {}]   ;;  %s903_s6 = inlined_call_operand.vmem [shape: f32[1,128], index: 6, kind: input, shape index: {}]   ;;  %s904_s7 = inlined_call_operand.hbm [shape: f32[8,128], index: 7, kind: output, shape index: {}]  }
   0x1   :  { %13 = vsyncpa [#allocation6], 0 }
   0x2   :  { %14 = vsyncpa [#allocation9], 0 }
   0x3   :  { %15 = vsyncpa [#allocation4], 0  ;;  %s739_s24 = smov [#allocation5]   ;;  %s621_s28 = scalar_lea.hbm %s898_s1, 2048 }
   0x4   :  { %s31_s25 = sshll.u32 %s739_s24, 4  ;;  %p622_p0 = scmp.ne.s32.totalorder %s898_s1, %s621_s28  ;;  %s32_s25 = int_to_ptr.vmem [resolvable:$true] %s31_s25 }
   0x5   :  { %p625_p1 = scmp.lt.u32.totalorder %s621_s28, %s898_s1 }
   0x7   :  { %p627_p2 = pnand %p625_p1, %p622_p0 }
   0x9   :  { %630 = shalt.err (!%p627_p2)
}
   0xa   :  { %s631_s10 = scalar_lea.vmem %s32_s25, 2048  ;;  %p636_p4 = scmp.lt.s32.totalorder %s32_s25, %s32_s25 }
   0xb   :  { %p632_p3 = scmp.ne.s32.totalorder %s32_s25, %s631_s10  ;;  %p637_p5 = scmp.lt.s32.totalorder %s631_s10, %s631_s10 }
   0xd   :  { %p638_p6 = por %p637_p5, %p636_p4 }
   0xf   :  { %p639_p7 = pnand %p638_p6, %p632_p3 }
  0x11   :  { %642 = shalt.err (!%p639_p7)
}
  0x12   :  { %s740_s11 = smov 128   ;;  %s741_s12 = smov 8  }
  0x13   :  { %37 = dma.hbm_to_vmem [thread:$0]  %s898_s1, 2048, %s32_s25, [#allocation6], %s740_s11, %s740_s11, %s741_s12  }
  0x14   :  { %s742_s15 = smov [#allocation2]   ;;  %s743_s17 = smov [#allocation7]  }
  0x15   :  { %s22_s16 = sshll.u32 %s742_s15, 4  ;;  %s43_s18 = sshll.u32 %s743_s17, 4  ;;  %s23_s16 = int_to_ptr.vmem [resolvable:$true] %s22_s16  ;;  %s44_s18 = int_to_ptr.vmem [resolvable:$true] %s43_s18 }
  0x16   :  { %s643_s21 = scalar_lea.hbm %s897_s0, 128 }
  0x17   :  { %p644_p8 = scmp.ne.s32.totalorder %s897_s0, %s643_s21  ;;  %p647_p9 = scmp.lt.u32.totalorder %s643_s21, %s897_s0 }
  0x19   :  { %p649_p10 = pnand %p647_p9, %p644_p8 }
  0x1b   :  { %652 = shalt.err (!%p649_p10)
}
  0x1c   :  { %s653_s1 = scalar_lea.vmem %s23_s16, 128  ;;  %p658_p12 = scmp.lt.s32.totalorder %s23_s16, %s23_s16 }
  0x1d   :  { %p654_p11 = scmp.ne.s32.totalorder %s23_s16, %s653_s1  ;;  %p659_p13 = scmp.lt.s32.totalorder %s653_s1, %s653_s1 }
  0x1f   :  { %p660_p0 = por %p659_p13, %p658_p12 }
  0x21   :  { %p661_p1 = pnand %p660_p0, %p654_p11 }
  0x23   :  { %664 = shalt.err (!%p661_p1)
}
  0x24   :  { %25 = dma.hbm_to_vmem [thread:$0]  %s897_s0, 128, %s23_s16, [#allocation3]  }
  0x25   :  { %s665_s30 = scalar_lea.hbm %s899_s2, 2048 }
  0x26   :  { %p666_p2 = scmp.ne.s32.totalorder %s899_s2, %s665_s30  ;;  %p669_p3 = scmp.lt.u32.totalorder %s665_s30, %s899_s2 }
  0x28   :  { %p671_p4 = pnand %p669_p3, %p666_p2 }
  0x2a   :  { %674 = shalt.err (!%p671_p4)
}
  0x2b   :  { %s675_s14 = scalar_lea.vmem %s44_s18, 2048  ;;  %p680_p6 = scmp.lt.s32.totalorder %s44_s18, %s44_s18 }
  0x2c   :  { %p676_p5 = scmp.ne.s32.totalorder %s44_s18, %s675_s14  ;;  %p681_p7 = scmp.lt.s32.totalorder %s675_s14, %s675_s14 }
  0x2e   :  { %p682_p8 = por %p681_p7, %p680_p6 }
  0x30   :  { %p683_p9 = pnand %p682_p8, %p676_p5 }
  0x32   :  { %686 = shalt.err (!%p683_p9)
}
  0x33   :  { %49 = dma.hbm_to_vmem [thread:$0]  %s899_s2, 2048, %s44_s18, [#allocation6], %s740_s11, %s740_s11, %s741_s12  }
  0x34   :  { %s744_s16 = smov [#allocation8]   ;;  %s687_s21 = scalar_lea.hbm %s900_s3, 2048 }
  0x35   :  { %s55_s17 = sshll.u32 %s744_s16, 4  ;;  %p688_p10 = scmp.ne.s32.totalorder %s900_s3, %s687_s21  ;;  %s56_s17 = int_to_ptr.vmem [resolvable:$true] %s55_s17 }
  0x36   :  { %p691_p11 = scmp.lt.u32.totalorder %s687_s21, %s900_s3 }
  0x38   :  { %p693_p12 = pnand %p691_p11, %p688_p10 }
  0x3a   :  { %696 = shalt.err (!%p693_p12)
}
  0x3b   :  { %s697_s1 = scalar_lea.vmem %s56_s17, 2048  ;;  %p702_p0 = scmp.lt.s32.totalorder %s56_s17, %s56_s17 }
  0x3c   :  { %p698_p13 = scmp.ne.s32.totalorder %s56_s17, %s697_s1  ;;  %p703_p1 = scmp.lt.s32.totalorder %s697_s1, %s697_s1 }
  0x3e   :  { %p704_p2 = por %p703_p1, %p702_p0 }
  0x40   :  { %p705_p3 = pnand %p704_p2, %p698_p13 }
  0x42   :  { %708 = shalt.err (!%p705_p3)
}
  0x43   :  { %61 = dma.hbm_to_vmem [thread:$0]  %s900_s3, 2048, %s56_s17, [#allocation9], %s740_s11, %s740_s11, %s741_s12  }
  0x44   :  { %731 = dma.done.wait [#allocation3], 128  }
  0x45   :  { %732 = vsyncadd [#allocation3], 4294967168 }
  0x46   :  { %733 = dma.done.wait [#allocation6], 4096  }
  0x47   :  { %734 = vsyncadd [#allocation6], 4294963200 }
  0x48   :  { %735 = dma.done.wait [#allocation9], 2048  }
  0x49   :  { %736 = vsyncadd [#allocation9], 4294965248  ;;  %v745_v0 = vmov 0.0|0.0   ;;  %vm746_vm0 = vmmov 0   ;;  %v747_v1 = vmov 0.0   ;;  %v81_v2 = vld [vmem:[#allocation5] sm:$0xff] }
  0x4a   :  { %539 = vmatprep.subr.bf16.mxu0 %v745_v0  ;;  %466 = vmatprep.mubr.msk.f32.mxu0 %vm746_vm0, %v747_v1  ;;  %v82_v3 = vld [vmem:[#allocation5 + $0x8] sm:$0xff]  ;;  %v83_v4 = vld [vmem:[#allocation5 + $0x10] sm:$0xff]  ;;  %v84_v6 = vld [vmem:[#allocation5 + $0x18] sm:$0xff] }
  0x4b   :  { %563 = vmatprep.subr.bf16.mxu1 %v745_v0  ;;  %501 = vmatprep.mubr.msk.f32.mxu1 %vm746_vm0, %v747_v1  ;;  %v540_v5 = vpack.c.bf16 %v82_v3, %v81_v2  ;;  %v543_v7 = vpack.c.bf16 %v84_v6, %v83_v4  ;;  %v85_v8 = vld [vmem:[#allocation5 + $0x20] sm:$0xff]  ;;  %v86_v9 = vld [vmem:[#allocation5 + $0x28] sm:$0xff]  ;;  %v176_v12 = vld [vmem:[#allocation7 + $0x10] sm:$0xff] }
  0x4c   :  { %v174_v10 = vld [vmem:[#allocation7] sm:$0xff]  ;;  %v175_v11 = vld [vmem:[#allocation7 + $0x8] sm:$0xff]  ;;  %v177_v13 = vld [vmem:[#allocation7 + $0x18] sm:$0xff]  ;;  %v546_v14 = vpack.c.bf16 %v86_v9, %v85_v8 }
  0x4d   :  { %541 = vmatpush3.bf16.msra.mxu0 %v540_v5  ;;  %v564_v15 = vpack.c.bf16 %v175_v11, %v174_v10  ;;  %v87_v16 = vld [vmem:[#allocation5 + $0x30] sm:$0xff]  ;;  %v88_v17 = vld [vmem:[#allocation5 + $0x38] sm:$0xff]  ;;  %v567_v18 = vpack.c.bf16 %v177_v13, %v176_v12  ;;  %v178_v19 = vld [vmem:[#allocation7 + $0x20] sm:$0xff] }
  0x4e   :  { %542 = vmatprep.subr.bf16.mxu0 %v745_v0  ;;  %v179_v20 = vld [vmem:[#allocation7 + $0x28] sm:$0xff]  ;;  %v549_v21 = vpack.c.bf16 %v88_v17, %v87_v16  ;;  %v89_v22 = vld [vmem:[#allocation5 + $0x40] sm:$0xff]  ;;  %v180_v25 = vld [vmem:[#allocation7 + $0x30] sm:$0xff] }
  0x4f   :  { %565 = vmatpush3.bf16.msra.mxu1 %v564_v15  ;;  %v90_v23 = vld [vmem:[#allocation5 + $0x48] sm:$0xff]  ;;  %v570_v24 = vpack.c.bf16 %v179_v20, %v178_v19  ;;  %v181_v26 = vld [vmem:[#allocation7 + $0x38] sm:$0xff]  ;;  %v91_v28 = vld [vmem:[#allocation5 + $0x50] sm:$0xff] }
  0x50   :  { %566 = vmatprep.subr.bf16.mxu1 %v745_v0  ;;  %v552_v27 = vpack.c.bf16 %v90_v23, %v89_v22  ;;  %v92_v29 = vld [vmem:[#allocation5 + $0x58] sm:$0xff]  ;;  %v573_v30 = vpack.c.bf16 %v181_v26, %v180_v25  ;;  %v182_v31 = vld [vmem:[#allocation7 + $0x40] sm:$0xff]  ;;  %v183_v32 = vld [vmem:[#allocation7 + $0x48] sm:$0xff] }
  0x51   :  { %544 = vmatpush3.bf16.msra.mxu0 %v543_v7  ;;  %v555_v33 = vpack.c.bf16 %v92_v29, %v91_v28  ;;  %v93_v34 = vld [vmem:[#allocation5 + $0x60] sm:$0xff]  ;;  %v94_v35 = vld [vmem:[#allocation5 + $0x68] sm:$0xff]  ;;  %v576_v36 = vpack.c.bf16 %v183_v32, %v182_v31  ;;  %v184_v37 = vld [vmem:[#allocation7 + $0x50] sm:$0xff] }
  0x52   :  { %545 = vmatprep.subr.bf16.mxu0 %v745_v0  ;;  %v185_v38 = vld [vmem:[#allocation7 + $0x58] sm:$0xff]  ;;  %v558_v39 = vpack.c.bf16 %v94_v35, %v93_v34  ;;  %v95_v40 = vld [vmem:[#allocation5 + $0x70] sm:$0xff]  ;;  %v186_v43 = vld [vmem:[#allocation7 + $0x60] sm:$0xff] }
  0x53   :  { %568 = vmatpush3.bf16.msra.mxu1 %v567_v18  ;;  %v96_v41 = vld [vmem:[#allocation5 + $0x78] sm:$0xff]  ;;  %v579_v42 = vpack.c.bf16 %v185_v38, %v184_v37  ;;  %v187_v44 = vld [vmem:[#allocation7 + $0x68] sm:$0xff]  ;;  %v188_v48 = vld [vmem:[#allocation7 + $0x70] sm:$0xff] }
  0x54   :  { %569 = vmatprep.subr.bf16.mxu1 %v745_v0  ;;  %v561_v45 = vpack.c.bf16 %v96_v41, %v95_v40  ;;  %v582_v46 = vpack.c.bf16 %v187_v44, %v186_v43  ;;  %v80_v47 = vld [vmem:[#allocation2] sm:$0xff]  ;;  %v268_v51 = vld [vmem:[#allocation8] sm:$0xff]  ;;  %v269_v52 = vld [vmem:[#allocation8 + $0x8] sm:$0xff] }
  0x55   :  { %547 = vmatpush3.bf16.msra.mxu0 %v546_v14  ;;  %v189_v49 = vld [vmem:[#allocation7 + $0x78] sm:$0xff]  ;;  %v270_v53 = vld [vmem:[#allocation8 + $0x10] sm:$0xff]  ;;  %v588_v54 = vpack.c.bf16 %v269_v52, %v268_v51  ;;  %v272_v57 = vld [vmem:[#allocation8 + $0x20] sm:$0xff] }
  0x56   :  { %548 = vmatprep.subr.bf16.mxu0 %v745_v0  ;;  %v585_v50 = vpack.c.bf16 %v189_v49, %v188_v48  ;;  %v271_v55 = vld [vmem:[#allocation8 + $0x18] sm:$0xff]  ;;  %v273_v58 = vld [vmem:[#allocation8 + $0x28] sm:$0xff]  ;;  %v274_v60 = vld [vmem:[#allocation8 + $0x30] sm:$0xff] }
  0x57   :  { %571 = vmatpush3.bf16.msra.mxu1 %v570_v24  ;;  %v591_v56 = vpack.c.bf16 %v271_v55, %v270_v53  ;;  %v594_v59 = vpack.c.bf16 %v273_v58, %v272_v57  ;;  %v275_v61 = vld [vmem:[#allocation8 + $0x38] sm:$0xff]  ;;  %v276_v63 = vld [vmem:[#allocation8 + $0x40] sm:$0xff]  ;;  %v278_v3 = vld [vmem:[#allocation8 + $0x50] sm:$0xff] }
  0x58   :  { %572 = vmatprep.subr.bf16.mxu1 %v745_v0  ;;  %v597_v62 = vpack.c.bf16 %v275_v61, %v274_v60  ;;  %v279_v4 = vld [vmem:[#allocation8 + $0x58] sm:$0xff]  ;;  %v280_v6 = vld [vmem:[#allocation8 + $0x60] sm:$0xff]  ;;  %v281_v7 = vld [vmem:[#allocation8 + $0x68] sm:$0xff] }
  0x59   :  { %550 = vmatpush3.bf16.msra.mxu0 %v549_v21  ;;  %v603_v5 = vpack.c.bf16 %v279_v4, %v278_v3  ;;  %v606_v8 = vpack.c.bf16 %v281_v7, %v280_v6  ;;  %v380_v9 = vld [vmem:[%s901_s4] ss:$0 sm:$0xff]  ;;  %v282_v13 = vld [vmem:[#allocation8 + $0x70] sm:$0xff]  ;;  %s748_s4 = smov [#allocation10]  }
  0x5a   :  { %551 = vmatprep.subr.bf16.mxu0 %v745_v0  ;;  %v283_v14 = vld [vmem:[#allocation8 + $0x78] sm:$0xff]  ;;  %s369_s29 = sshll.u32 %s748_s4, 4  ;;  %s370_s29 = int_to_ptr.vmem [resolvable:$true] %s369_s29 }
  0x5b   :  { %574 = vmatpush3.bf16.msra.mxu1 %v573_v30  ;;  %v609_v15 = vpack.c.bf16 %v283_v14, %v282_v13  ;;  %v381_v16 = vld [vmem:[%s902_s5] ss:$0 sm:$0xff]  ;;  %s709_s30 = scalar_lea.vmem %s370_s29, 128  ;;  %p714_p5 = scmp.lt.s32.totalorder %s370_s29, %s370_s29 }
  0x5c   :  { %575 = vmatprep.subr.bf16.mxu1 %v745_v0  ;;  %v382_v20 = vld [vmem:[%s903_s6] ss:$0 sm:$0xff]  ;;  %p710_p4 = scmp.ne.s32.totalorder %s370_s29, %s709_s30  ;;  %p715_p6 = scmp.lt.s32.totalorder %s709_s30, %s709_s30 }
  0x5d   :  { %553 = vmatpush3.bf16.msra.mxu0 %v552_v27 }
  0x5e   :  { %554 = vmatprep.subr.bf16.mxu0 %v745_v0  ;;  %p716_p7 = por %p715_p6, %p714_p5 }
  0x5f   :  { %577 = vmatpush3.bf16.msra.mxu1 %v576_v36 }
  0x60   :  { %578 = vmatprep.subr.bf16.mxu1 %v745_v0  ;;  %p717_p8 = pnand %p716_p7, %p710_p4 }
  0x61   :  { %556 = vmatpush3.bf16.msra.mxu0 %v555_v33 }
  0x62   :  { %557 = vmatprep.subr.bf16.mxu0 %v745_v0 }
  0x63   :  { %580 = vmatpush3.bf16.msra.mxu1 %v579_v42 }
  0x64   :  { %581 = vmatprep.subr.bf16.mxu1 %v745_v0 }
  0x65   :  { %559 = vmatpush3.bf16.msra.mxu0 %v558_v39 }
  0x66   :  { %560 = vmatprep.subr.bf16.mxu0 %v745_v0 }
  0x67   :  { %583 = vmatpush3.bf16.msra.mxu1 %v582_v46 }
  0x68   :  { %584 = vmatprep.subr.bf16.mxu1 %v745_v0 }
  0x69   :  { %562 = vmatpush3.bf16.msra.mxu0 %v561_v45 }
  0x6a   :  { %587 = vmatprep.subr.bf16.mxu0 %v745_v0 }
  0x6b   :  { %586 = vmatpush3.bf16.msra.mxu1 %v585_v50 }
  0x6c   :  { %467 = vmatmul.mubr.f32.vlgmr.msra.gmra.mrb[0].mxu0 %v80_v47 }
  0x6d   :  { %536 = vmatprep.mubr.msk.f32.mxu0 %vm746_vm0, %v747_v1  ;;  %589 = vmatpush3.bf16.msra.mxu0 %v588_v54  ;;  %v277_v1 = vld [vmem:[#allocation8 + $0x48] sm:$0xff] }
  0x6e   :  { %590 = vmatprep.subr.bf16.mxu0 %v745_v0  ;;  %v600_v2 = vpack.c.bf16 %v277_v1, %v276_v63 }
  0x71   :  { %592 = vmatpush3.bf16.msra.mxu0 %v591_v56 }
  0x72   :  { %593 = vmatprep.subr.bf16.mxu0 %v745_v0 }
  0x75   :  { %595 = vmatpush3.bf16.msra.mxu0 %v594_v59 }
  0x76   :  { %596 = vmatprep.subr.bf16.mxu0 %v745_v0 }
  0x79   :  { %598 = vmatpush3.bf16.msra.mxu0 %v597_v62 }
  0x7a   :  { %599 = vmatprep.subr.bf16.mxu0 %v745_v0 }
  0x7d   :  { %601 = vmatpush3.bf16.msra.mxu0 %v600_v2 }
  0x7e   :  { %602 = vmatprep.subr.bf16.mxu0 %v745_v0 }
  0x81   :  { %604 = vmatpush3.bf16.msra.mxu0 %v603_v5 }
  0x82   :  { %605 = vmatprep.subr.bf16.mxu0 %v745_v0 }
  0x85   :  { %607 = vmatpush3.bf16.msra.mxu0 %v606_v8 }
  0x86   :  { %608 = vmatprep.subr.bf16.mxu0 %v745_v0 }
  0x89   :  { %610 = vmatpush3.bf16.msra.mxu0 %v609_v15 }
 0x13f   :  { %v170_v10 = vpop.f32.mrb[0].mxu0 }
 0x140   :  { %v171_v11 = vadd.f32 %v380_v9, %v170_v10  ;;  %v468_v12 = vpop.f32.mrb[1].mxu0 }
 0x142   :  { %502 = vmatmul.mubr.f32.vlgmr.msra.gmra.mrb[0].mxu1 %v171_v11 }
 0x215   :  { %v263_v17 = vpop.f32.mrb[0].mxu1 }
 0x216   :  { %v264_v18 = vadd.f32 %v381_v16, %v263_v17  ;;  %v503_v19 = vpop.f32.mrb[1].mxu1 }
 0x218   :  { %v267_v0 = vmax.f32 %v264_v18, 0.0 }
 0x21a   :  { %537 = vmatmul.mubr.f32.vlgmr.msra.gmra.mrb[2].mxu0 %v267_v0 }
 0x2ed   :  { %v357_v21 = vpop.f32.mrb[2].mxu0 }
 0x2ee   :  { %v358_v22 = vadd.f32 %v382_v20, %v357_v21  ;;  %v538_v23 = vpop.f32.mrb[3].mxu0 }
 0x2f0   :  { %v361_v24 = vmax.f32 %v358_v22, 0.0 }
 0x2f2   :  { %362 = vst [vmem:[#allocation10] sm:$0xff] %v361_v24 }
 0x2f3   :  { %720 = shalt.err (!%p717_p8)
}
 0x2f4   :  { %s721_s9 = scalar_lea.hbm %s904_s7, 128 }
 0x2f5   :  { %p722_p9 = scmp.ne.s32.totalorder %s904_s7, %s721_s9  ;;  %p725_p10 = scmp.lt.u32.totalorder %s721_s9, %s904_s7 }
 0x2f7   :  { %p727_p11 = pnand %p725_p10, %p722_p9 }
 0x2f9   :  { %730 = shalt.err (!%p727_p11)
}
 0x2fa   :  { %372 = dma.vmem_to_hbm [thread:$0]  %s370_s29, 128, %s904_s7, [#allocation4]  }
 0x2fb   :  { %737 = dma.done.wait [#allocation4], 128  }
 0x2fc   :  { %738 = vsyncadd [#allocation4], 4294967168 }
 0x2fd   :  { %376 = vsyncpa [#allocation3], 1 }
 0x2fe   :  { %377 = vsyncpa [#allocation6], 1 }
 0x2ff   :  { %378 = vsyncpa [#allocation9], 1 }
 0x300   :  { %379 = vsyncpa [#allocation4], 1 }

// kernel: tpu_custom_call.1
= control target key start
LH: loop header
LB: loop body
LE: loop exit
PB: predicated region body
PF: predicated region fallthrough
CT: control target
= control target key end

     0   :  { %12 = vsyncpa [#allocation3], 0  ;;  %s897_s0 = inlined_call_operand.hbm [shape: f32[8,128], index: 0, kind: input, shape index: {}]   ;;  %s898_s1 = inlined_call_operand.hbm [shape: f32[128,128], index: 1, kind: input, shape index: {}]   ;;  %s899_s2 = inlined_call_operand.hbm [shape: f32[128,128], index: 2, kind: input, shape index: {}]   ;;  %s900_s3 = inlined_call_operand.hbm [shape: f32[128,128], index: 3, kind: input, shape index: {}]   ;;  %s901_s4 = inlined_call_operand.vmem [shape: f32[1,128], index: 4, kind: input, shape index: {}]   ;;  %s902_s5 = inlined_call_operand.vmem [shape: f32[1,128], index: 5, kind: input, shape index: {}]   ;;  %s903_s6 = inlined_call_operand.vmem [shape: f32[1,128], index: 6, kind: input, shape index: {}]   ;;  %s904_s7 = inlined_call_operand.hbm [shape: f32[8,128], index: 7, kind: output, shape index: {}]  }
   0x1   :  { %13 = vsyncpa [#allocation6], 0 }
   0x2   :  { %14 = vsyncpa [#allocation9], 0 }
   0x3   :  { %15 = vsyncpa [#allocation4], 0  ;;  %s739_s24 = smov [#allocation5]   ;;  %s621_s28 = scalar_lea.hbm %s898_s1, 2048 }
   0x4   :  { %s31_s25 = sshll.u32 %s739_s24, 4  ;;  %p622_p0 = scmp.ne.s32.totalorder %s898_s1, %s621_s28  ;;  %s32_s25 = int_to_ptr.vmem [resolvable:$true] %s31_s25 }
   0x5   :  { %p625_p1 = scmp.lt.u32.totalorder %s621_s28, %s898_s1 }
   0x7   :  { %p627_p2 = pnand %p625_p1, %p622_p0 }
   0x9   :  { %630 = shalt.err (!%p627_p2)
}
   0xa   :  { %s631_s10 = scalar_lea.vmem %s32_s25, 2048  ;;  %p636_p4 = scmp.lt.s32.totalorder %s32_s25, %s32_s25 }
   0xb   :  { %p632_p3 = scmp.ne.s32.totalorder %s32_s25, %s631_s10  ;;  %p637_p5 = scmp.lt.s32.totalorder %s631_s10, %s631_s10 }
   0xd   :  { %p638_p6 = por %p637_p5, %p636_p4 }
   0xf   :  { %p639_p7 = pnand %p638_p6, %p632_p3 }
  0x11   :  { %642 = shalt.err (!%p639_p7)
}
  0x12   :  { %s740_s11 = smov 128   ;;  %s741_s12 = smov 8  }
  0x13   :  { %37 = dma.hbm_to_vmem [thread:$0]  %s898_s1, 2048, %s32_s25, [#allocation6], %s740_s11, %s740_s11, %s741_s12  }
  0x14   :  { %s742_s15 = smov [#allocation2]   ;;  %s743_s17 = smov [#allocation7]  }
  0x15   :  { %s22_s16 = sshll.u32 %s742_s15, 4  ;;  %s43_s18 = sshll.u32 %s743_s17, 4  ;;  %s23_s16 = int_to_ptr.vmem [resolvable:$true] %s22_s16  ;;  %s44_s18 = int_to_ptr.vmem [resolvable:$true] %s43_s18 }
  0x16   :  { %s643_s21 = scalar_lea.hbm %s897_s0, 128 }
  0x17   :  { %p644_p8 = scmp.ne.s32.totalorder %s897_s0, %s643_s21  ;;  %p647_p9 = scmp.lt.u32.totalorder %s643_s21, %s897_s0 }
  0x19   :  { %p649_p10 = pnand %p647_p9, %p644_p8 }
  0x1b   :  { %652 = shalt.err (!%p649_p10)
}
  0x1c   :  { %s653_s1 = scalar_lea.vmem %s23_s16, 128  ;;  %p658_p12 = scmp.lt.s32.totalorder %s23_s16, %s23_s16 }
  0x1d   :  { %p654_p11 = scmp.ne.s32.totalorder %s23_s16, %s653_s1  ;;  %p659_p13 = scmp.lt.s32.totalorder %s653_s1, %s653_s1 }
  0x1f   :  { %p660_p0 = por %p659_p13, %p658_p12 }
  0x21   :  { %p661_p1 = pnand %p660_p0, %p654_p11 }
  0x23   :  { %664 = shalt.err (!%p661_p1)
}
  0x24   :  { %25 = dma.hbm_to_vmem [thread:$0]  %s897_s0, 128, %s23_s16, [#allocation3]  }
  0x25   :  { %s665_s30 = scalar_lea.hbm %s899_s2, 2048 }
  0x26   :  { %p666_p2 = scmp.ne.s32.totalorder %s899_s2, %s665_s30  ;;  %p669_p3 = scmp.lt.u32.totalorder %s665_s30, %s899_s2 }
  0x28   :  { %p671_p4 = pnand %p669_p3, %p666_p2 }
  0x2a   :  { %674 = shalt.err (!%p671_p4)
}
  0x2b   :  { %s675_s14 = scalar_lea.vmem %s44_s18, 2048  ;;  %p680_p6 = scmp.lt.s32.totalorder %s44_s18, %s44_s18 }
  0x2c   :  { %p676_p5 = scmp.ne.s32.totalorder %s44_s18, %s675_s14  ;;  %p681_p7 = scmp.lt.s32.totalorder %s675_s14, %s675_s14 }
  0x2e   :  { %p682_p8 = por %p681_p7, %p680_p6 }
  0x30   :  { %p683_p9 = pnand %p682_p8, %p676_p5 }
  0x32   :  { %686 = shalt.err (!%p683_p9)
}
  0x33   :  { %49 = dma.hbm_to_vmem [thread:$0]  %s899_s2, 2048, %s44_s18, [#allocation6], %s740_s11, %s740_s11, %s741_s12  }
  0x34   :  { %s744_s16 = smov [#allocation8]   ;;  %s687_s21 = scalar_lea.hbm %s900_s3, 2048 }
  0x35   :  { %s55_s17 = sshll.u32 %s744_s16, 4  ;;  %p688_p10 = scmp.ne.s32.totalorder %s900_s3, %s687_s21  ;;  %s56_s17 = int_to_ptr.vmem [resolvable:$true] %s55_s17 }
  0x36   :  { %p691_p11 = scmp.lt.u32.totalorder %s687_s21, %s900_s3 }
  0x38   :  { %p693_p12 = pnand %p691_p11, %p688_p10 }
  0x3a   :  { %696 = shalt.err (!%p693_p12)
}
  0x3b   :  { %s697_s1 = scalar_lea.vmem %s56_s17, 2048  ;;  %p702_p0 = scmp.lt.s32.totalorder %s56_s17, %s56_s17 }
  0x3c   :  { %p698_p13 = scmp.ne.s32.totalorder %s56_s17, %s697_s1  ;;  %p703_p1 = scmp.lt.s32.totalorder %s697_s1, %s697_s1 }
  0x3e   :  { %p704_p2 = por %p703_p1, %p702_p0 }
  0x40   :  { %p705_p3 = pnand %p704_p2, %p698_p13 }
  0x42   :  { %708 = shalt.err (!%p705_p3)
}
  0x43   :  { %61 = dma.hbm_to_vmem [thread:$0]  %s900_s3, 2048, %s56_s17, [#allocation9], %s740_s11, %s740_s11, %s741_s12  }
  0x44   :  { %731 = dma.done.wait [#allocation3], 128  }
  0x45   :  { %732 = vsyncadd [#allocation3], 4294967168 }
  0x46   :  { %733 = dma.done.wait [#allocation6], 4096  }
  0x47   :  { %734 = vsyncadd [#allocation6], 4294963200 }
  0x48   :  { %735 = dma.done.wait [#allocation9], 2048  }
  0x49   :  { %736 = vsyncadd [#allocation9], 4294965248  ;;  %v745_v0 = vmov 0.0|0.0   ;;  %vm746_vm0 = vmmov 0   ;;  %v747_v1 = vmov 0.0   ;;  %v81_v2 = vld [vmem:[#allocation5] sm:$0xff] }
  0x4a   :  { %539 = vmatprep.subr.bf16.mxu0 %v745_v0  ;;  %466 = vmatprep.mubr.msk.f32.mxu0 %vm746_vm0, %v747_v1  ;;  %v82_v3 = vld [vmem:[#allocation5 + $0x8] sm:$0xff]  ;;  %v83_v4 = vld [vmem:[#allocation5 + $0x10] sm:$0xff]  ;;  %v84_v6 = vld [vmem:[#allocation5 + $0x18] sm:$0xff] }
  0x4b   :  { %563 = vmatprep.subr.bf16.mxu1 %v745_v0  ;;  %501 = vmatprep.mubr.msk.f32.mxu1 %vm746_vm0, %v747_v1  ;;  %v540_v5 = vpack.c.bf16 %v82_v3, %v81_v2  ;;  %v543_v7 = vpack.c.bf16 %v84_v6, %v83_v4  ;;  %v85_v8 = vld [vmem:[#allocation5 + $0x20] sm:$0xff]  ;;  %v86_v9 = vld [vmem:[#allocation5 + $0x28] sm:$0xff]  ;;  %v176_v12 = vld [vmem:[#allocation7 + $0x10] sm:$0xff] }
  0x4c   :  { %v174_v10 = vld [vmem:[#allocation7] sm:$0xff]  ;;  %v175_v11 = vld [vmem:[#allocation7 + $0x8] sm:$0xff]  ;;  %v177_v13 = vld [vmem:[#allocation7 + $0x18] sm:$0xff]  ;;  %v546_v14 = vpack.c.bf16 %v86_v9, %v85_v8 }
  0x4d   :  { %541 = vmatpush3.bf16.msra.mxu0 %v540_v5  ;;  %v564_v15 = vpack.c.bf16 %v175_v11, %v174_v10  ;;  %v87_v16 = vld [vmem:[#allocation5 + $0x30] sm:$0xff]  ;;  %v88_v17 = vld [vmem:[#allocation5 + $0x38] sm:$0xff]  ;;  %v567_v18 = vpack.c.bf16 %v177_v13, %v176_v12  ;;  %v178_v19 = vld [vmem:[#allocation7 + $0x20] sm:$0xff] }
  0x4e   :  { %542 = vmatprep.subr.bf16.mxu0 %v745_v0  ;;  %v179_v20 = vld [vmem:[#allocation7 + $0x28] sm:$0xff]  ;;  %v549_v21 = vpack.c.bf16 %v88_v17, %v87_v16  ;;  %v89_v22 = vld [vmem:[#allocation5 + $0x40] sm:$0xff]  ;;  %v180_v25 = vld [vmem:[#allocation7 + $0x30] sm:$0xff] }
  0x4f   :  { %565 = vmatpush3.bf16.msra.mxu1 %v564_v15  ;;  %v90_v23 = vld [vmem:[#allocation5 + $0x48] sm:$0xff]  ;;  %v570_v24 = vpack.c.bf16 %v179_v20, %v178_v19  ;;  %v181_v26 = vld [vmem:[#allocation7 + $0x38] sm:$0xff]  ;;  %v91_v28 = vld [vmem:[#allocation5 + $0x50] sm:$0xff] }
  0x50   :  { %566 = vmatprep.subr.bf16.mxu1 %v745_v0  ;;  %v552_v27 = vpack.c.bf16 %v90_v23, %v89_v22  ;;  %v92_v29 = vld [vmem:[#allocation5 + $0x58] sm:$0xff]  ;;  %v573_v30 = vpack.c.bf16 %v181_v26, %v180_v25  ;;  %v182_v31 = vld [vmem:[#allocation7 + $0x40] sm:$0xff]  ;;  %v183_v32 = vld [vmem:[#allocation7 + $0x48] sm:$0xff] }
  0x51   :  { %544 = vmatpush3.bf16.msra.mxu0 %v543_v7  ;;  %v555_v33 = vpack.c.bf16 %v92_v29, %v91_v28  ;;  %v93_v34 = vld [vmem:[#allocation5 + $0x60] sm:$0xff]  ;;  %v94_v35 = vld [vmem:[#allocation5 + $0x68] sm:$0xff]  ;;  %v576_v36 = vpack.c.bf16 %v183_v32, %v182_v31  ;;  %v184_v37 = vld [vmem:[#allocation7 + $0x50] sm:$0xff] }
  0x52   :  { %545 = vmatprep.subr.bf16.mxu0 %v745_v0  ;;  %v185_v38 = vld [vmem:[#allocation7 + $0x58] sm:$0xff]  ;;  %v558_v39 = vpack.c.bf16 %v94_v35, %v93_v34  ;;  %v95_v40 = vld [vmem:[#allocation5 + $0x70] sm:$0xff]  ;;  %v186_v43 = vld [vmem:[#allocation7 + $0x60] sm:$0xff] }
  0x53   :  { %568 = vmatpush3.bf16.msra.mxu1 %v567_v18  ;;  %v96_v41 = vld [vmem:[#allocation5 + $0x78] sm:$0xff]  ;;  %v579_v42 = vpack.c.bf16 %v185_v38, %v184_v37  ;;  %v187_v44 = vld [vmem:[#allocation7 + $0x68] sm:$0xff]  ;;  %v188_v48 = vld [vmem:[#allocation7 + $0x70] sm:$0xff] }
  0x54   :  { %569 = vmatprep.subr.bf16.mxu1 %v745_v0  ;;  %v561_v45 = vpack.c.bf16 %v96_v41, %v95_v40  ;;  %v582_v46 = vpack.c.bf16 %v187_v44, %v186_v43  ;;  %v80_v47 = vld [vmem:[#allocation2] sm:$0xff]  ;;  %v268_v51 = vld [vmem:[#allocation8] sm:$0xff]  ;;  %v269_v52 = vld [vmem:[#allocation8 + $0x8] sm:$0xff] }
  0x55   :  { %547 = vmatpush3.bf16.msra.mxu0 %v546_v14  ;;  %v189_v49 = vld [vmem:[#allocation7 + $0x78] sm:$0xff]  ;;  %v270_v53 = vld [vmem:[#allocation8 + $0x10] sm:$0xff]  ;;  %v588_v54 = vpack.c.bf16 %v269_v52, %v268_v51  ;;  %v272_v57 = vld [vmem:[#allocation8 + $0x20] sm:$0xff] }
  0x56   :  { %548 = vmatprep.subr.bf16.mxu0 %v745_v0  ;;  %v585_v50 = vpack.c.bf16 %v189_v49, %v188_v48  ;;  %v271_v55 = vld [vmem:[#allocation8 + $0x18] sm:$0xff]  ;;  %v273_v58 = vld [vmem:[#allocation8 + $0x28] sm:$0xff]  ;;  %v274_v60 = vld [vmem:[#allocation8 + $0x30] sm:$0xff] }
  0x57   :  { %571 = vmatpush3.bf16.msra.mxu1 %v570_v24  ;;  %v591_v56 = vpack.c.bf16 %v271_v55, %v270_v53  ;;  %v594_v59 = vpack.c.bf16 %v273_v58, %v272_v57  ;;  %v275_v61 = vld [vmem:[#allocation8 + $0x38] sm:$0xff]  ;;  %v276_v63 = vld [vmem:[#allocation8 + $0x40] sm:$0xff]  ;;  %v278_v3 = vld [vmem:[#allocation8 + $0x50] sm:$0xff] }
  0x58   :  { %572 = vmatprep.subr.bf16.mxu1 %v745_v0  ;;  %v597_v62 = vpack.c.bf16 %v275_v61, %v274_v60  ;;  %v279_v4 = vld [vmem:[#allocation8 + $0x58] sm:$0xff]  ;;  %v280_v6 = vld [vmem:[#allocation8 + $0x60] sm:$0xff]  ;;  %v281_v7 = vld [vmem:[#allocation8 + $0x68] sm:$0xff] }
  0x59   :  { %550 = vmatpush3.bf16.msra.mxu0 %v549_v21  ;;  %v603_v5 = vpack.c.bf16 %v279_v4, %v278_v3  ;;  %v606_v8 = vpack.c.bf16 %v281_v7, %v280_v6  ;;  %v380_v9 = vld [vmem:[%s901_s4] ss:$0 sm:$0xff]  ;;  %v282_v13 = vld [vmem:[#allocation8 + $0x70] sm:$0xff]  ;;  %s748_s4 = smov [#allocation10]  }
  0x5a   :  { %551 = vmatprep.subr.bf16.mxu0 %v745_v0  ;;  %v283_v14 = vld [vmem:[#allocation8 + $0x78] sm:$0xff]  ;;  %s369_s29 = sshll.u32 %s748_s4, 4  ;;  %s370_s29 = int_to_ptr.vmem [resolvable:$true] %s369_s29 }
  0x5b   :  { %574 = vmatpush3.bf16.msra.mxu1 %v573_v30  ;;  %v609_v15 = vpack.c.bf16 %v283_v14, %v282_v13  ;;  %v381_v16 = vld [vmem:[%s902_s5] ss:$0 sm:$0xff]  ;;  %s709_s30 = scalar_lea.vmem %s370_s29, 128  ;;  %p714_p5 = scmp.lt.s32.totalorder %s370_s29, %s370_s29 }
  0x5c   :  { %575 = vmatprep.subr.bf16.mxu1 %v745_v0  ;;  %v382_v20 = vld [vmem:[%s903_s6] ss:$0 sm:$0xff]  ;;  %p710_p4 = scmp.ne.s32.totalorder %s370_s29, %s709_s30  ;;  %p715_p6 = scmp.lt.s32.totalorder %s709_s30, %s709_s30 }
  0x5d   :  { %553 = vmatpush3.bf16.msra.mxu0 %v552_v27 }
  0x5e   :  { %554 = vmatprep.subr.bf16.mxu0 %v745_v0  ;;  %p716_p7 = por %p715_p6, %p714_p5 }
  0x5f   :  { %577 = vmatpush3.bf16.msra.mxu1 %v576_v36 }
  0x60   :  { %578 = vmatprep.subr.bf16.mxu1 %v745_v0  ;;  %p717_p8 = pnand %p716_p7, %p710_p4 }
  0x61   :  { %556 = vmatpush3.bf16.msra.mxu0 %v555_v33 }
  0x62   :  { %557 = vmatprep.subr.bf16.mxu0 %v745_v0 }
  0x63   :  { %580 = vmatpush3.bf16.msra.mxu1 %v579_v42 }
  0x64   :  { %581 = vmatprep.subr.bf16.mxu1 %v745_v0 }
  0x65   :  { %559 = vmatpush3.bf16.msra.mxu0 %v558_v39 }
  0x66   :  { %560 = vmatprep.subr.bf16.mxu0 %v745_v0 }
  0x67   :  { %583 = vmatpush3.bf16.msra.mxu1 %v582_v46 }
  0x68   :  { %584 = vmatprep.subr.bf16.mxu1 %v745_v0 }
  0x69   :  { %562 = vmatpush3.bf16.msra.mxu0 %v561_v45 }
  0x6a   :  { %587 = vmatprep.subr.bf16.mxu0 %v745_v0 }
  0x6b   :  { %586 = vmatpush3.bf16.msra.mxu1 %v585_v50 }
  0x6c   :  { %467 = vmatmul.mubr.f32.vlgmr.msra.gmra.mrb[0].mxu0 %v80_v47 }
  0x6d   :  { %536 = vmatprep.mubr.msk.f32.mxu0 %vm746_vm0, %v747_v1  ;;  %589 = vmatpush3.bf16.msra.mxu0 %v588_v54  ;;  %v277_v1 = vld [vmem:[#allocation8 + $0x48] sm:$0xff] }
  0x6e   :  { %590 = vmatprep.subr.bf16.mxu0 %v745_v0  ;;  %v600_v2 = vpack.c.bf16 %v277_v1, %v276_v63 }
  0x71   :  { %592 = vmatpush3.bf16.msra.mxu0 %v591_v56 }
  0x72   :  { %593 = vmatprep.subr.bf16.mxu0 %v745_v0 }
  0x75   :  { %595 = vmatpush3.bf16.msra.mxu0 %v594_v59 }
  0x76   :  { %596 = vmatprep.subr.bf16.mxu0 %v745_v0 }
  0x79   :  { %598 = vmatpush3.bf16.msra.mxu0 %v597_v62 }
  0x7a   :  { %599 = vmatprep.subr.bf16.mxu0 %v745_v0 }
  0x7d   :  { %601 = vmatpush3.bf16.msra.mxu0 %v600_v2 }
  0x7e   :  { %602 = vmatprep.subr.bf16.mxu0 %v745_v0 }
  0x81   :  { %604 = vmatpush3.bf16.msra.mxu0 %v603_v5 }
  0x82   :  { %605 = vmatprep.subr.bf16.mxu0 %v745_v0 }
  0x85   :  { %607 = vmatpush3.bf16.msra.mxu0 %v606_v8 }
  0x86   :  { %608 = vmatprep.subr.bf16.mxu0 %v745_v0 }
  0x89   :  { %610 = vmatpush3.bf16.msra.mxu0 %v609_v15 }
 0x13f   :  { %v170_v10 = vpop.f32.mrb[0].mxu0 }
 0x140   :  { %v171_v11 = vadd.f32 %v380_v9, %v170_v10  ;;  %v468_v12 = vpop.f32.mrb[1].mxu0 }
 0x142   :  { %502 = vmatmul.mubr.f32.vlgmr.msra.gmra.mrb[0].mxu1 %v171_v11 }
 0x215   :  { %v263_v17 = vpop.f32.mrb[0].mxu1 }
 0x216   :  { %v264_v18 = vadd.f32 %v381_v16, %v263_v17  ;;  %v503_v19 = vpop.f32.mrb[1].mxu1 }
 0x218   :  { %v267_v0 = vmax.f32 %v264_v18, 0.0 }
 0x21a   :  { %537 = vmatmul.mubr.f32.vlgmr.msra.gmra.mrb[2].mxu0 %v267_v0 }
 0x2ed   :  { %v357_v21 = vpop.f32.mrb[2].mxu0 }
 0x2ee   :  { %v358_v22 = vadd.f32 %v382_v20, %v357_v21  ;;  %v538_v23 = vpop.f32.mrb[3].mxu0 }
 0x2f0   :  { %v361_v24 = vmax.f32 %v358_v22, 0.0 }
 0x2f2   :  { %362 = vst [vmem:[#allocation10] sm:$0xff] %v361_v24 }
 0x2f3   :  { %720 = shalt.err (!%p717_p8)
}
 0x2f4   :  { %s721_s9 = scalar_lea.hbm %s904_s7, 128 }
 0x2f5   :  { %p722_p9 = scmp.ne.s32.totalorder %s904_s7, %s721_s9  ;;  %p725_p10 = scmp.lt.u32.totalorder %s721_s9, %s904_s7 }
 0x2f7   :  { %p727_p11 = pnand %p725_p10, %p722_p9 }
 0x2f9   :  { %730 = shalt.err (!%p727_p11)
}
 0x2fa   :  { %372 = dma.vmem_to_hbm [thread:$0]  %s370_s29, 128, %s904_s7, [#allocation4]  }
 0x2fb   :  { %737 = dma.done.wait [#allocation4], 128  }
 0x2fc   :  { %738 = vsyncadd [#allocation4], 4294967168 }
 0x2fd   :  { %376 = vsyncpa [#allocation3], 1 }
 0x2fe   :  { %377 = vsyncpa [#allocation6], 1 }
 0x2ff   :  { %378 = vsyncpa [#allocation9], 1 }
 0x300   :  { %379 = vsyncpa [#allocation4], 1 }

</bundles_post_ra>
